<compile_context>
chip_gen: v7x
topology: tpu7x:2x2x1
jax: 0.10.0
libtpu: 0.0.40
codegen_flags: <defaults>
</compile_context>

<pallas_src>
import jax
import jax.numpy as jnp
from jax.experimental import pallas as pl
from jax.experimental.pallas import tpu as pltpu


def se_kernel(x_ref, w1_ref, w2g_ref, w2b_ref, o_ref):
    # x_ref  : (1, C, T)  channel-major spatial tile (lanes = spatial pixels)
    # w1_ref : (Cr, C)    conv1 weight (PyTorch (Cr, C, 1, 1) squeezed)
    # w2g_ref: (C, Cr)    gate half of conv2 weight
    # w2b_ref: (C, Cr)    bias half of conv2 weight
    x = x_ref[0].astype(jnp.float32)                                   # (C, T)
    cr = w1_ref.shape[0]

    # First 1x1 conv (contracts over C channels on sublanes) + ReLU, on MXU.
    h = jnp.maximum(
        jnp.dot(w1_ref[...].astype(jnp.float32), x,
                preferred_element_type=jnp.float32), 0.0)              # (Cr, T)

    if cr <= 8:
        # Second 1x1 conv has a tiny contraction dim (Cr = C // reduction):
        # do it as Cr rank-1 VPU updates instead of a tiny-K MXU matmul, so
        # MXU drain latency stays off the DMA-bound critical path.
        gate = w2g_ref[:, 0:1].astype(jnp.float32) * h[0:1, :]         # (C, T)
        bias = w2b_ref[:, 0:1].astype(jnp.float32) * h[0:1, :]
        for r in range(1, cr):
            hr = h[r:r + 1, :]
            gate = gate + w2g_ref[:, r:r + 1].astype(jnp.float32) * hr
            bias = bias + w2b_ref[:, r:r + 1].astype(jnp.float32) * hr
    else:
        gate = jnp.dot(w2g_ref[...].astype(jnp.float32), h,
                       preferred_element_type=jnp.float32)
        bias = jnp.dot(w2b_ref[...].astype(jnp.float32), h,
                       preferred_element_type=jnp.float32)

    o_ref[0] = (x * jax.nn.sigmoid(gate) + bias).astype(o_ref.dtype)


def _pick_spatial_tile(hw, tile_hw):
    """Pick a lane tile. Prefer a 128-aligned divisor of HW (no padding copy)."""
    if hw <= tile_hw:
        return hw, 0
    t_max = (min(tile_hw, hw) // 128) * 128
    # Prefer the largest 128-aligned tile that exactly divides HW -> no jnp.pad
    # (padding forces a full HBM copy of x, +~50% read traffic on an HBM-bound op).
    t = t_max
    while t >= 128:
        if hw % t == 0:
            return t, 0
        t -= 128
    # No aligned divisor: fall back to padding the ragged tail. Pad lanes never
    # contaminate valid outputs (the contraction is over channels, not space)
    # and are sliced off in the wrapper.
    t = max(128, t_max)
    return t, (-hw) % t


def se_block(x, w1, w2, *, tile_hw=8192):
    """SEBlock forward.

    Args:
      x : (N, C, H, W) float32, NCHW (same layout as the PyTorch module).
      w1: (Cr, C)   conv1 weight, i.e. PyTorch (Cr, C, 1, 1) squeezed.
      w2: (2C, Cr)  conv2 weight, i.e. PyTorch (2C, Cr, 1, 1) squeezed.
      tile_hw: max spatial (lane) tile per grid step.
    """
    n, c, hh, ww = x.shape
    cr = w1.shape[0]
    assert w1.shape == (cr, c), w1.shape
    assert w2.shape == (2 * c, cr), w2.shape

    hw = hh * ww
    xr = x.reshape(n, c, hw)                 # free reshape, stays channel-major

    # Split conv2 into gate/bias halves once, outside the kernel.
    w2g = w2[:c]                             # (C, Cr)
    w2b = w2[c:]                             # (C, Cr)

    t, pad = _pick_spatial_tile(hw, tile_hw)
    if pad:
        xr = jnp.pad(xr, ((0, 0), (0, 0), (0, pad)))
    hw_p = hw + pad

    grid = (n, hw_p // t)

    p_total = n * hw
    cost = pl.CostEstimate(
        flops=p_total * (2 * c * cr + 4 * c * cr + 3 * c),
        transcendentals=p_total * c,                     # sigmoid
        bytes_accessed=2 * p_total * c * 4 + (w1.size + w2.size) * 4,
    )

    out = pl.pallas_call(
        se_kernel,
        out_shape=jax.ShapeDtypeStruct((n, c, hw_p), x.dtype),
        grid_spec=pltpu.PrefetchScalarGridSpec(
            num_scalar_prefetch=0,
            grid=grid,
            in_specs=[
                pl.BlockSpec((1, c, t), lambda nb, tb: (nb, 0, tb)),  # x tile
                pl.BlockSpec((cr, c), lambda nb, tb: (0, 0)),         # W1
                pl.BlockSpec((c, cr), lambda nb, tb: (0, 0)),         # W2 gate
                pl.BlockSpec((c, cr), lambda nb, tb: (0, 0)),         # W2 bias
            ],
            out_specs=pl.BlockSpec((1, c, t), lambda nb, tb: (nb, 0, tb)),
        ),
        compiler_params=pltpu.CompilerParams(
            dimension_semantics=("parallel", "parallel")),
        cost_estimate=cost,
    )(xr, w1, w2g, w2b)

    if pad:
        out = out[:, :, :hw]
    return out.reshape(n, c, hh, ww)


def se_block_reference(x, w1, w2):
    """Pure-JAX reference mirroring the PyTorch forward."""
    n, c, hh, ww = x.shape
    xr = x.reshape(n, c, hh * ww).astype(jnp.float32)
    h = jnp.maximum(jnp.einsum("rc,ncp->nrp", w1, xr), 0.0)
    y = jnp.einsum("or,nrp->nop", w2, h)                 # (N, 2C, HW)
    gate, bias = y[:, :c], y[:, c:]
    out = xr * jax.nn.sigmoid(gate) + bias
    return out.reshape(n, c, hh, ww).astype(x.dtype)


if __name__ == "__main__":
    # Module config: channels=32, reduction=16 -> hidden Cr = 2, conv2 out = 64.
    channels, reduction = 32, 16
    hidden = channels // reduction
    N, H, W = 2, 16, 16

    key = jax.random.PRNGKey(0)
    kx, k1, k2 = jax.random.split(key, 3)

    x = jax.random.normal(kx, (N, channels, H, W), dtype=jnp.float32)
    # Conv2d(channels, hidden, 1, bias=False) weight is (hidden, channels, 1, 1);
    # stored squeezed as (hidden, channels).
    w1 = jax.random.normal(k1, (hidden, channels), dtype=jnp.float32) * 0.2
    # Conv2d(hidden, 2*channels, 1, bias=False) -> stored as (2*channels, hidden).
    w2 = jax.random.normal(k2, (2 * channels, hidden), dtype=jnp.float32) * 0.2

    out = jax.block_until_ready(se_block(x, w1, w2))
    ref = se_block_reference(x, w1, w2)

    assert out.shape == x.shape and out.dtype == x.dtype
    assert jnp.allclose(out, ref, atol=1e-5, rtol=1e-5), "mismatch vs reference"

    print("KERNEL_OK")
</pallas_src>

<mosaic_0001>
module attributes {stable_mosaic.version = 11 : i64} {
  func.func @se_kernel(%arg0: i32, %arg1: i32, %arg2: memref<1x32x256xf32, #tpu.memory_space<vmem>>, %arg3: memref<2x32xf32, #tpu.memory_space<vmem>>, %arg4: memref<32x2xf32, #tpu.memory_space<vmem>>, %arg5: memref<32x2xf32, #tpu.memory_space<vmem>>, %arg6: memref<1x32x256xf32, #tpu.memory_space<vmem>>) attributes {dimension_semantics = [#tpu.dimension_semantics<parallel>, #tpu.dimension_semantics<parallel>], iteration_bounds = array<i64: 2, 1>, scalar_prefetch = 0 : i64, scratch_operands = 0 : i64, tpu.core_type = #tpu.core_type<tc>, window_params = [{transform_indices = @transform_0, window_bounds = array<i64: 1, 32, 256>}, {pipeline_mode = #tpu.pipeline_mode<synchronous>, transform_indices = @transform_1, window_bounds = array<i64: 2, 32>}, {pipeline_mode = #tpu.pipeline_mode<synchronous>, transform_indices = @transform_2, window_bounds = array<i64: 32, 2>}, {pipeline_mode = #tpu.pipeline_mode<synchronous>, transform_indices = @transform_3, window_bounds = array<i64: 32, 2>}, {transform_indices = @transform_4, window_bounds = array<i64: 1, 32, 256>}]} {
    %c0 = arith.constant 0 : index
    %c0_0 = arith.constant 0 : index
    %c0_1 = arith.constant 0 : index
    %0 = vector.load %arg2[%c0, %c0_0, %c0_1] : memref<1x32x256xf32, #tpu.memory_space<vmem>>, vector<1x32x256xf32>
    %1 = vector.shape_cast %0 : vector<1x32x256xf32> to vector<32x256xf32>
    %c0_2 = arith.constant 0 : index
    %c0_3 = arith.constant 0 : index
    %2 = vector.load %arg3[%c0_2, %c0_3] : memref<2x32xf32, #tpu.memory_space<vmem>>, vector<2x32xf32>
    %cst = arith.constant dense<0.000000e+00> : vector<2x256xf32>
    %3 = tpu.matmul %2, %1, %cst {dimension_numbers = #tpu.dot_dimension_numbers<[1], [0], [0], [1], [0, 0, 1, 1], [], []>} : vector<2x32xf32>, vector<32x256xf32>, vector<2x256xf32> -> vector<2x256xf32>
    %cst_4 = arith.constant 0.000000e+00 : f32
    %4 = vector.broadcast %cst_4 : f32 to vector<2x256xf32>
    %5 = arith.maximumf %3, %4 : vector<2x256xf32>
    %c0_5 = arith.constant 0 : index
    %c0_6 = arith.constant 0 : index
    %6 = vector.load %arg4[%c0_5, %c0_6] : memref<32x2xf32, #tpu.memory_space<vmem>>, vector<32x1xf32>
    %7 = vector.extract_strided_slice %5 {offsets = [0, 0], sizes = [1, 256], strides = [1, 1]} : vector<2x256xf32> to vector<1x256xf32>
    %8 = vector.broadcast %6 : vector<32x1xf32> to vector<32x256xf32>
    %9 = vector.broadcast %7 : vector<1x256xf32> to vector<32x256xf32>
    %10 = arith.mulf %8, %9 : vector<32x256xf32>
    %c0_7 = arith.constant 0 : index
    %c0_8 = arith.constant 0 : index
    %11 = vector.load %arg5[%c0_7, %c0_8] : memref<32x2xf32, #tpu.memory_space<vmem>>, vector<32x1xf32>
    %12 = vector.extract_strided_slice %5 {offsets = [0, 0], sizes = [1, 256], strides = [1, 1]} : vector<2x256xf32> to vector<1x256xf32>
    %13 = vector.broadcast %11 : vector<32x1xf32> to vector<32x256xf32>
    %14 = vector.broadcast %12 : vector<1x256xf32> to vector<32x256xf32>
    %15 = arith.mulf %13, %14 : vector<32x256xf32>
    %16 = vector.extract_strided_slice %5 {offsets = [1, 0], sizes = [1, 256], strides = [1, 1]} : vector<2x256xf32> to vector<1x256xf32>
    %c0_9 = arith.constant 0 : index
    %c1 = arith.constant 1 : index
    %17 = vector.load %arg4[%c0_9, %c1] : memref<32x2xf32, #tpu.memory_space<vmem>>, vector<32x1xf32>
    %18 = vector.broadcast %17 : vector<32x1xf32> to vector<32x256xf32>
    %19 = vector.broadcast %16 : vector<1x256xf32> to vector<32x256xf32>
    %20 = arith.mulf %18, %19 : vector<32x256xf32>
    %21 = arith.addf %10, %20 : vector<32x256xf32>
    %c0_10 = arith.constant 0 : index
    %c1_11 = arith.constant 1 : index
    %22 = vector.load %arg5[%c0_10, %c1_11] : memref<32x2xf32, #tpu.memory_space<vmem>>, vector<32x1xf32>
    %23 = vector.broadcast %22 : vector<32x1xf32> to vector<32x256xf32>
    %24 = vector.broadcast %16 : vector<1x256xf32> to vector<32x256xf32>
    %25 = arith.mulf %23, %24 : vector<32x256xf32>
    %26 = arith.addf %15, %25 : vector<32x256xf32>
    %27 = arith.negf %21 : vector<32x256xf32>
    %28 = math.exp %27 : vector<32x256xf32>
    %cst_12 = arith.constant 1.000000e+00 : f32
    %29 = vector.broadcast %cst_12 : f32 to vector<32x256xf32>
    %30 = arith.addf %29, %28 : vector<32x256xf32>
    %31 = arith.divf %29, %30 : vector<32x256xf32>
    %32 = arith.mulf %1, %31 : vector<32x256xf32>
    %33 = arith.addf %32, %26 : vector<32x256xf32>
    %c0_13 = arith.constant 0 : index
    %c0_14 = arith.constant 0 : index
    %c0_15 = arith.constant 0 : index
    %34 = vector.load %arg6[%c0_13, %c0_14, %c0_15] : memref<1x32x256xf32, #tpu.memory_space<vmem>>, vector<1x32x256xf32>
    %35 = vector.shape_cast %34 : vector<1x32x256xf32> to vector<32x256xf32>
    %36 = vector.shape_cast %33 : vector<32x256xf32> to vector<1x32x256xf32>
    tpu.vector_store %arg6[%c0_13, %c0_14, %c0_15], %36 {strides = array<i32>} : memref<1x32x256xf32, #tpu.memory_space<vmem>>, vector<1x32x256xf32>,
    return
  }
  func.func @transform_0(%arg0: i32, %arg1: i32) -> (i32, i32, i32) {
    %c0_i32 = arith.constant 0 : i32
    %c0_i32_0 = arith.constant 0 : i32
    return %arg0, %c0_i32, %arg1 : i32, i32, i32
  }
  func.func @transform_1(%arg0: i32, %arg1: i32) -> (i32, i32) {
    %c0_i32 = arith.constant 0 : i32
    %c0_i32_0 = arith.constant 0 : i32
    %c0_i32_1 = arith.constant 0 : i32
    return %c0_i32, %c0_i32_0 : i32, i32
  }
  func.func @transform_2(%arg0: i32, %arg1: i32) -> (i32, i32) {
    %c0_i32 = arith.constant 0 : i32
    %c0_i32_0 = arith.constant 0 : i32
    %c0_i32_1 = arith.constant 0 : i32
    return %c0_i32, %c0_i32_0 : i32, i32
  }
  func.func @transform_3(%arg0: i32, %arg1: i32) -> (i32, i32) {
    %c0_i32 = arith.constant 0 : i32
    %c0_i32_0 = arith.constant 0 : i32
    %c0_i32_1 = arith.constant 0 : i32
    return %c0_i32, %c0_i32_0 : i32, i32
  }
  func.func @transform_4(%arg0: i32, %arg1: i32) -> (i32, i32, i32) {
    %c0_i32 = arith.constant 0 : i32
    %c0_i32_0 = arith.constant 0 : i32
    return %arg0, %c0_i32, %arg1 : i32, i32, i32
  }
}

</mosaic_0001>

<bundles_post_ra>
// kernel: tpu_custom_call.1
= control target key start
LH: loop header
LB: loop body
LE: loop exit
PB: predicated region body
PF: predicated region fallthrough
CT: control target
= control target key end

     0   :  { %9 = vsyncpa [#allocation3], 0  ;;  %s1229_s0 = inlined_call_operand.hbm [shape: f32[2,32,256], index: 0, kind: input, shape index: {}]   ;;  %s1230_s1 = inlined_call_operand.vmem [shape: f32[2,32], index: 1, kind: input, shape index: {}]   ;;  %s1231_s2 = inlined_call_operand.vmem [shape: f32[32,2], index: 2, kind: input, shape index: {}]   ;;  %s1232_s3 = inlined_call_operand.vmem [shape: f32[32,2], index: 3, kind: input, shape index: {}]   ;;  %s1233_s4 = inlined_call_operand.hbm [shape: f32[2,32,256], index: 4, kind: output, shape index: {}]  }
   0x1   :  { %11 = vsyncpa [#allocation3 + $0x1], 0 }
   0x2   :  { %12 = vsyncpa [#allocation4], 0 }
   0x3   :  { %14 = vsyncpa [#allocation4 + $0x1], 0  ;;  %s932_s15 = smov 0   ;;  %s934_s16 = smov 0  }
   0x4   :  { %s936_s17 = smov 0   ;;  %s938_s18 = smov 0  }
   0x5   :  { %s940_s19 = smov 0   ;;  %s942_s20 = smov 0  }
   0x6 LB: > { %s641_s21 = sadd.s32 4294967295, %s896_s20   ;;  %s642_s22 = sadd.s32 4294967294, %s896_s20   ;;  %s896_s20 = sphi %s942_s20, %s20_s20   ;;  %s892_s19 = sphi %s940_s19, %s1248_s19   ;;  %s888_s18 = sphi %s938_s18, %s1247_s18   ;;  %s884_s17 = sphi %s936_s17, %s1246_s17   ;;  %s880_s16 = sphi %s934_s16, %s1245_s16   ;;  %s876_s15 = sphi %s932_s15, %s1244_s15  }
   0x7   : > { %s32_s23 = sadd.s32 1, %s892_s19  ;;  %s41_s24 = sadd.s32 1, %s884_s17 }
   0x8   : > { %p34_p0 = scmp.ge.s32.totalorder %s32_s23, 2  ;;  %p48_p1 = scmp.ne.s32.totalorder %s884_s17, %s880_s16 }
   0x9   : > { %p49_p2 = scmp.eq.s32.totalorder %s896_s20, 0  ;;  %p54_p3 = scmp.ne.s32.totalorder %s880_s16, %s876_s15 }
   0xa   : > { %s1250_s23 = smov (%p34_p0, %s32_s23), 0  ;;  %p55_p5 = scmp.eq.s32.totalorder %s641_s21, 0 }
   0xb   : > { %p973_p4 = por %p49_p2, %p48_p1  ;;  %s36_s26 = ssub.s32 %s892_s19, %s1250_s23 }
   0xc   : > { %p143_p6 = scmp.eq.s32.totalorder %s641_s21, 1  ;;  %p39_p7 = scmp.eq.s32.totalorder %s36_s26, 0 }
   0xd   : > { %p979_p8 = por %p55_p5, %p54_p3  ;;  %p149_p10 = scmp.eq.s32.totalorder %s642_s22, 1 }
   0xe   : > { %p983_p9 = por %p143_p6, %p48_p1  ;;  %p687_p13 = scmp.lt.s32.totalorder %s896_s20, 2 }
   0xf   : > { %s988_s29 = scalar_select %p39_p7, %s884_s17, %s41_s24  }
  0x10   : > { %s1237_s28 = scalar_select %p983_p9, 1, 0 }
  0x11   : > { %p990_p11 = por %p149_p10, %p54_p3  ;;  %s178_s5 = sand.u32 1, %s884_s17  }
  0x12   : > { %s645_s6 = sshll.u32 %s178_s5, 6  ;;  %s665_s7 = sshll.u32 %s892_s19, 10 }
  0x13   : > { %s1238_s30 = scalar_select %p990_p11, 1, 0 }
  0x14   : > { %s1001_s10 = scalar_lea.hbm %s1229_s0, %s665_s7  ;;  %s182_s11 = scalar_lea.vmem [#allocation2], %s645_s6 }
  0x15   : > { %s191_s12 = sshll.u32 %s182_s11, 4  ;;  %p1007_p0 = pnand %p687_p13, %p973_p4  ;;  %s1003_s12 = int_to_ptr.vmem [resolvable:$true] %s191_s12 }
  0x16   : > { %s1012_s14 = scalar_lea.sflag [#allocation3], %s178_s5  ;;  %s784_s21 = scalar_lea.hbm %s1001_s10, 1024 }
  0x17   : > { %p785_p2 = scmp.ne.s32.totalorder %s1001_s10, %s784_s21  ;;  %p786_p3 = pneg %p1007_p0 }
  0x18   : > { %s789_s25 = scalar_lea.hbm %s1229_s0, 2048  ;;  %p790_p4 = scmp.lt.u32.totalorder %s1001_s10, %s1229_s0 }
  0x19   : > { %p787_p5 = pnand %p786_p3, %p785_p2  ;;  %p791_p7 = scmp.lt.u32.totalorder %s789_s25, %s784_s21 }
  0x1a   : > { %p793_p13 = scmp.lt.u32.totalorder %s784_s21, %s1001_s10 }
  0x1b   : > { %p788_p6 = pneg %p787_p5  ;;  %p792_p10 = por %p791_p7, %p790_p4 }
  0x1d   : > { %p794_p12 = por %p793_p13, %p792_p10 }
  0x1f   : > { %p795_p1 = pnand %p794_p12, %p788_p6 }
  0x21   : > { %798 = shalt.err (!%p795_p1)
}
  0x22   : > { %s799_s5 = scalar_lea.vmem %s1003_s12, 1024  ;;  %s898_s7 = smov [#allocation2]  }
  0x23   : > { %p800_p2 = scmp.ne.s32.totalorder %s1003_s12, %s799_s5  ;;  %s804_s8 = sshll.u32 %s898_s7, 4  ;;  %s805_s8 = int_to_ptr.vmem [resolvable:$false] %s804_s8 }
  0x24   : > { %s806_s9 = scalar_lea.vmem %s805_s8, 2048  ;;  %p807_p9 = scmp.lt.s32.totalorder %s1003_s12, %s805_s8 }
  0x25   : > { %p802_p5 = pnand %p800_p2, %p786_p3  ;;  %p808_p4 = scmp.lt.s32.totalorder %s806_s9, %s799_s5 }
  0x27   : > { %p803_p11 = pneg %p802_p5  ;;  %p809_p7 = por %p808_p4, %p807_p9 }
  0x29   : > { %p810_p10 = pnand %p809_p7, %p803_p11 }
  0x2b   : > { %813 = shalt.err (!%p810_p10)
}
  0x2c   : > { %s899_s11 = smov 256   ;;  %s900_s21 = smov 16  }
  0x2d   : > { %682 = dma.hbm_to_vmem [thread:$0]  (!%p1007_p0), %s1001_s10, 1024, %s1003_s12, %s1012_s14, %s899_s11, %s899_s11, %s900_s21  }
  0x2e   : > { %p199_p12 = scmp.lt.s32.totalorder %s896_s20, 3  ;;  %p1240_p1 = scmp.ge.s32.totalorder %s896_s20, 1 }
  0x30   : > { %p200_p3 = pnand %p1240_p1, %p199_p12 }
  0x31   : > { %s1044_s22 = sand.u32 (!%p200_p3), 1, %s880_s16  }
  0x32   : > { %203 = sbr.rel (%p200_p3) target bundleno = 341 (0x155), region = 36  ;;  %s649_s24 = sshll.u32 (!%p200_p3), %s1044_s22, 6 }
  0x33   : > { %s206_s25 = scalar_lea.sflag (!%p200_p3), [#allocation3], %s1044_s22  ;;  %s209_s26 = scalar_lea.vmem (!%p200_p3), [#allocation2], %s649_s24 }
  0x39   : > { %867 = dma.done.wait (%p979_p8), %s206_s25, 1024  }
  0x3a   : > { %869 = vsyncadd (%p979_p8), %s206_s25, 4294966272  ;;  %v901_v0 = vmov 0.0   ;;  %v902_v1 = vmov 0   ;;  %v1054_v2 = vld [vmem:[%s209_s26 + $0x8] sm:$0xff]  ;;  %v1056_v3 = vld [vmem:[%s209_s26 + $0x18] sm:$0xff]  ;;  %vm245_vm0 = vcmask 261120   ;;  %v346_v25 = vlaneseq }
  0x3b   : > { %313 = vmatprep.mubr.f32.mxu0 %v901_v0  ;;  %745 = vset.pattern.permute.xlu1 %v902_v1  ;;  %v1058_v4 = vld [vmem:[%s209_s26] sm:$0xff]  ;;  %v667_v5 = vpack.c.bf16 %v1056_v3, %v1054_v2  ;;  %v1062_v6 = vld [vmem:[%s209_s26 + $0x10] sm:$0xff]  ;;  %v1064_v7 = vld [vmem:[%s209_s26 + $0x28] sm:$0xff]  ;;  %v903_v19 = vmov 1   ;;  %s1153_s14 = scalar_lea.vmem [#allocation5], %s649_s24  ;;  %s666_s24 = sshll.u32 %s888_s18, 10 }
  0x3c   : > { %744 = vset.pattern.permute.xlu0 %v902_v1  ;;  %v1066_v8 = vld [vmem:[%s209_s26 + $0x38] sm:$0xff]  ;;  %v669_v9 = vpack.c.bf16 %v1062_v6, %v1058_v4  ;;  %v1072_v11 = vld [vmem:[%s209_s26 + $0x20] sm:$0xff]  ;;  %v1074_v12 = vld [vmem:[%s209_s26 + $0x30] sm:$0xff]  ;;  %v347_v28 = vshrl.u32 %v346_v25, 7  ;;  %s554_s6 = sshll.u32 %s1153_s14, 4  ;;  %s1176_s8 = scalar_lea.hbm %s1233_s4, %s666_s24  ;;  %s1178_s6 = int_to_ptr.vmem [resolvable:$true] %s554_s6 }
  0x3d   : > { %v671_v10 = vpack.c.bf16 %v1066_v8, %v1064_v7  ;;  %668 = vmatprep.subr.bf16.mxu0 %v667_v5  ;;  %v324_v13 = vld [vmem:[%s1231_s2 + $0x10] sm:$0xff]  ;;  %v322_v14 = vld [vmem:[%s1231_s2] sm:$0xff]  ;;  %v673_v15 = vpack.c.bf16 %v1074_v12, %v1072_v11  ;;  %v325_v16 = vld [vmem:[%s1231_s2 + $0x18] sm:$0xff]  ;;  %s539_s18 = scalar_lea.sflag [#allocation4], %s1044_s22  ;;  %s814_s9 = scalar_lea.vmem %s1178_s6, 1024 }
  0x3e   : > { %670 = vmatpush1.bf16.msra.mxu0 %v669_v9  ;;  %338 = vperm.xlu1 %745, %v324_v13   ;;  %v244_v17 = vld [vmem:[%s1230_s1] sm:$0x3]  ;;  %v323_v18 = vld [vmem:[%s1231_s2 + $0x8] sm:$0xff]  ;;  %v364_v22 = vld [vmem:[%s1232_s3 + $0x10] sm:$0xff]  ;;  %v348_v31 = vsub.s32 0, %v347_v28  ;;  %v412_v32 = vsub.s32 1, %v347_v28  ;;  %p815_p8 = scmp.ne.s32.totalorder %s1178_s6, %s814_s9 }
  0x3f   : > { %672 = vmatprep.subr.bf16.mxu0 %v671_v10  ;;  %328 = vperm.xlu0 %744, %v322_v14   ;;  %v362_v20 = vld [vmem:[%s1232_s3] sm:$0xff]  ;;  %v363_v21 = vld [vmem:[%s1232_s3 + $0x8] sm:$0xff]  ;;  %v365_v23 = vld [vmem:[%s1232_s3 + $0x18] sm:$0xff]  ;;  %p1241_p9 = scmp.ne.s32.totalorder %s1237_s28, 0  ;;  %s904_s11 = smov [#allocation5]  }
  0x40   : > { %s818_s21 = sshll.u32 %s904_s11, 4  ;;  %s819_s21 = int_to_ptr.vmem [resolvable:$false] %s818_s21 }
  0x41   : > { %p816_p11 = pnand %p815_p8, %p1241_p9  ;;  %s820_s25 = scalar_lea.vmem %s819_s21, 2048 }
  0x42   : > { %674 = vmatpush1.bf16.msra.mxu0 %v673_v15  ;;  %343 = vperm.xlu1 %745, %v325_v16   ;;  %p821_p6 = scmp.lt.s32.totalorder %s1178_s6, %s819_s21  ;;  %p822_p13 = scmp.lt.s32.totalorder %s820_s25, %s814_s9 }
  0x43   : > { %333 = vperm.xlu0 %744, %v323_v18   ;;  %p817_p0 = pneg %p816_p11 }
  0x44   : > { %p823_p2 = por %p822_p13, %p821_p6 }
  0x45   : > { %651 = vmatmul.mubr.msk.f32.vlgmr.msra.gmra.mrb[0].mxu0 %vm245_vm0, %v244_v17 }
  0x46   : > { %747 = vset.pattern.permute.xlu1 %v903_v19  ;;  %p824_p5 = pnand %p823_p2, %p817_p0 }
  0x47   : > { %399 = vperm.xlu1 %747, %v323_v18   ;;  %746 = vset.pattern.permute.xlu0 %v903_v19 }
  0x48   : > { %395 = vperm.xlu0 %746, %v322_v14  }
  0x4b   : > { %403 = vperm.xlu1 %747, %v324_v13  }
  0x4c   : > { %407 = vperm.xlu0 %746, %v325_v16  }
  0x4f   : > { %748 = vset.pattern.permute.xlu1 %v902_v1 }
  0x50   : > { %368 = vperm.xlu1 %748, %v362_v20   ;;  %749 = vset.pattern.permute.xlu0 %v902_v1 }
  0x51   : > { %373 = vperm.xlu0 %749, %v363_v21  }
  0x54   : > { %378 = vperm.xlu1 %748, %v364_v22  }
  0x55   : > { %750 = vset.pattern.permute.xlu0 %v903_v19 }
  0x56   : > { %435 = vperm.xlu0 %750, %v362_v20  }
  0x58   : > { %383 = vperm.xlu1 %748, %v365_v23  }
  0x5a   : > { %447 = vperm.xlu0 %750, %v365_v23  }
  0x5c   : > { %751 = vset.pattern.permute.xlu1 %v903_v19 }
  0x5d   : > { %439 = vperm.xlu1 %751, %v363_v21  }
  0x61   : > { %443 = vperm.xlu1 %751, %v364_v22  }
  0xbd   : > { %v339_v24 = vpop.permute.xlu1 %338 }
  0xbe   : > { %v329_v27 = vpop.permute.xlu0 %328 }
  0xc1   : > { %v344_v26 = vpop.permute.xlu1 %343 }
  0xc2   : > { %v334_v30 = vpop.permute.xlu0 %333 }
  0xc6   : > { %v400_v29 = vpop.permute.xlu1 %399 }
  0xc7   : > { %v396_v41 = vpop.permute.xlu0 %395 }
  0xca   : > { %v404_v40 = vpop.permute.xlu1 %403 }
  0xcb   : > { %v408_v10 = vpop.permute.xlu0 %407 }
  0xcf   : > { %v369_v56 = vpop.permute.xlu1 %368 }
  0xd0   : > { %v374_v28 = vpop.permute.xlu0 %373 }
  0xd3   : > { %v1127_v14 = vpop.permute.xlu1 %378 }
 0x118   : > { %v315_v33 = vpop.f32.mrb[0].mxu0 }
 0x119   : > { %v320_v34 = vmax.f32 %v315_v33, 0.0  ;;  %v317_v35 = vpop.f32.mrb[1].mxu0 }
 0x11a   : > { %v321_v36 = vmax.f32 %v317_v35, 0.0 }
 0x11b   : > { %v1105_v37 = vrot.slane %v320_v34, %v348_v31  ;;  %v1107_v38 = vrot.slane %v320_v34, %v412_v32 }
 0x11c   : > { %v1109_v39 = vrot.slane %v321_v36, %v348_v31  ;;  %v1113_v44 = vrot.slane %v321_v36, %v412_v32 }
 0x11d   : > { %v354_v42 = vmul.f32 %v1105_v37, %v329_v27  ;;  %v356_v43 = vmul.f32 %v1105_v37, %v334_v30  ;;  %v418_v45 = vmul.f32 %v1107_v38, %v396_v41  ;;  %v420_v46 = vmul.f32 %v1107_v38, %v400_v29 }
 0x11e   : > { %v355_v47 = vmul.f32 %v1109_v39, %v329_v27  ;;  %v357_v48 = vmul.f32 %v1109_v39, %v334_v30  ;;  %v419_v51 = vmul.f32 %v1113_v44, %v396_v41  ;;  %v421_v52 = vmul.f32 %v1113_v44, %v400_v29 }
 0x11f   : > { %v426_v49 = vadd.f32 %v418_v45, %v354_v42  ;;  %v428_v50 = vadd.f32 %v420_v46, %v356_v43  ;;  %v358_v55 = vmul.f32 %v1105_v37, %v339_v24  ;;  %v359_v59 = vmul.f32 %v1109_v39, %v339_v24  ;;  %v1131_v24 = vpop.permute.xlu1 %383 }
 0x120   : > { %v427_v57 = vadd.f32 %v419_v51, %v355_v47  ;;  %v429_v58 = vadd.f32 %v421_v52, %v357_v48  ;;  %v422_v60 = vmul.f32 %v1107_v38, %v404_v40  ;;  %v423_v63 = vmul.f32 %v1113_v44, %v404_v40  ;;  %v436_v40 = vpop.permute.xlu0 %435 }
 0x121   : > { %v652_v53 = vmul.f32 -1.442695, %v426_v49  ;;  %v654_v54 = vmul.f32 -1.442695, %v428_v50  ;;  %v360_v5 = vmul.f32 %v1105_v37, %v344_v26  ;;  %v361_v9 = vmul.f32 %v1109_v39, %v344_v26 }
 0x122   : > { %v653_v61 = vmul.f32 -1.442695, %v427_v57  ;;  %v655_v62 = vmul.f32 -1.442695, %v429_v58  ;;  %v430_v0 = vadd.f32 %v422_v60, %v358_v55  ;;  %v431_v1 = vadd.f32 %v423_v63, %v359_v59 }
 0x123   : > { %752 = vpow2.f32 %v652_v53  ;;  %v424_v16 = vmul.f32 %v1107_v38, %v408_v10  ;;  %v425_v17 = vmul.f32 %v1113_v44, %v408_v10  ;;  %v440_v34 = vpop.permute.xlu1 %439  ;;  %v386_v41 = vmul.f32 %v369_v56, %v1105_v37 }
 0x124   : > { %754 = vpow2.f32 %v654_v54  ;;  %v656_v13 = vmul.f32 -1.442695, %v430_v0  ;;  %v657_v15 = vmul.f32 -1.442695, %v431_v1  ;;  %v450_v42 = vmul.f32 %v436_v40, %v1107_v38 }
 0x125   : > { %756 = vpow2.f32 %v653_v61  ;;  %v432_v18 = vadd.f32 %v424_v16, %v360_v5  ;;  %v433_v19 = vadd.f32 %v425_v17, %v361_v9  ;;  %v388_v45 = vmul.f32 %v374_v28, %v1105_v37  ;;  %v448_v16 = vpop.permute.xlu0 %447 }
 0x126   : > { %758 = vpow2.f32 %v655_v62  ;;  %v452_v46 = vmul.f32 %v440_v34, %v1107_v38  ;;  %v387_v48 = vmul.f32 %v369_v56, %v1109_v39  ;;  %v451_v49 = vmul.f32 %v436_v40, %v1113_v44 }
 0x127   : > { %760 = vpow2.f32 %v656_v13  ;;  %v658_v20 = vmul.f32 -1.442695, %v432_v18  ;;  %v659_v21 = vmul.f32 -1.442695, %v433_v19  ;;  %v389_v52 = vmul.f32 %v374_v28, %v1109_v39  ;;  %v444_v53 = vpop.permute.xlu1 %443 }
 0x128   : > { %762 = vpow2.f32 %v657_v15  ;;  %v458_v57 = vadd.f32 %v450_v42, %v386_v41  ;;  %v453_v59 = vmul.f32 %v440_v34, %v1113_v44  ;;  %v460_v60 = vadd.f32 %v452_v46, %v388_v45 }
 0x129   : > { %764 = vpow2.f32 %v658_v20  ;;  %v459_v63 = vadd.f32 %v451_v49, %v387_v48  ;;  %v390_v0 = vmul.f32 %v1127_v14, %v1105_v37  ;;  %v454_v1 = vmul.f32 %v444_v53, %v1107_v38 }
 0x12a   : > { %766 = vpow2.f32 %v659_v21  ;;  %v391_v10 = vmul.f32 %v1127_v14, %v1109_v39  ;;  %v455_v13 = vmul.f32 %v444_v53, %v1113_v44  ;;  %v461_v15 = vadd.f32 %v453_v59, %v389_v52 }
 0x12b   : > { %v462_v19 = vadd.f32 %v454_v1, %v390_v0 }
 0x12c   : > { %v463_v20 = vadd.f32 %v455_v13, %v391_v10 }
 0x12d   : > { %v753_v22 = vpop.eup %752 }
 0x12e   : > { %v755_v23 = vpop.eup %754  ;;  %v490_v25 = vadd.f32 1.0, %v753_v22  ;;  %v392_v22 = vmul.f32 %v1131_v24, %v1105_v37 }
 0x12f   : > { %v492_v26 = vadd.f32 1.0, %v755_v23  ;;  %v757_v27 = vpop.eup %756  ;;  %v456_v23 = vmul.f32 %v448_v16, %v1107_v38 }
 0x130   : > { %768 = vrcp.f32 %v490_v25  ;;  %v759_v29 = vpop.eup %758  ;;  %v491_v30 = vadd.f32 1.0, %v757_v27  ;;  %v457_v27 = vmul.f32 %v448_v16, %v1113_v44 }
 0x131   : > { %770 = vrcp.f32 %v492_v26  ;;  %v493_v31 = vadd.f32 1.0, %v759_v29  ;;  %v761_v32 = vpop.eup %760  ;;  %v393_v26 = vmul.f32 %v1131_v24, %v1109_v39  ;;  %v464_v37 = vadd.f32 %v456_v23, %v392_v22 }
 0x132   : > { %772 = vrcp.f32 %v491_v30  ;;  %v763_v33 = vpop.eup %762  ;;  %v494_v35 = vadd.f32 1.0, %v761_v32 }
 0x133   : > { %774 = vrcp.f32 %v493_v31  ;;  %v495_v36 = vadd.f32 1.0, %v763_v33  ;;  %v765_v43 = vpop.eup %764  ;;  %v465_v29 = vadd.f32 %v457_v27, %v393_v26 }
 0x134   : > { %776 = vrcp.f32 %v494_v35  ;;  %v767_v47 = vpop.eup %766  ;;  %v496_v50 = vadd.f32 1.0, %v765_v43 }
 0x135   : > { %778 = vrcp.f32 %v495_v36  ;;  %v497_v54 = vadd.f32 1.0, %v767_v47 }
 0x136   : > { %780 = vrcp.f32 %v496_v50 }
 0x137   : > { %782 = vrcp.f32 %v497_v54 }
 0x13a   : > { %v769_v51 = vpop.eup %768 }
 0x13b   : > { %v771_v55 = vpop.eup %770  ;;  %v514_v58 = vmul.f32 %v769_v51, %v1058_v4 }
 0x13c   : > { %v516_v61 = vmul.f32 %v771_v55, %v1062_v6  ;;  %v773_v56 = vpop.eup %772 }
 0x13d   : > { %v522_v62 = vadd.f32 %v514_v58, %v458_v57  ;;  %v775_v5 = vpop.eup %774  ;;  %v515_v4 = vmul.f32 %v773_v56, %v1054_v2 }
 0x13e   : > { %v524_v9 = vadd.f32 %v516_v61, %v460_v60  ;;  %v517_v6 = vmul.f32 %v775_v5, %v1056_v3  ;;  %v777_v17 = vpop.eup %776 }
 0x13f   : > { %530 = vst [vmem:[%s1153_s14] sm:$0xff] %v522_v62  ;;  %v523_v18 = vadd.f32 %v515_v4, %v459_v63  ;;  %v779_v2 = vpop.eup %778  ;;  %v518_v3 = vmul.f32 %v777_v17, %v1072_v11 }
 0x140   : > { %532 = vst [vmem:[%s1153_s14 + $0x10] sm:$0xff] %v524_v9  ;;  %v525_v14 = vadd.f32 %v517_v6, %v461_v15  ;;  %v519_v21 = vmul.f32 %v779_v2, %v1064_v7  ;;  %v781_v11 = vpop.eup %780 }
 0x141   : > { %531 = vst [vmem:[%s1153_s14 + $0x8] sm:$0xff] %v523_v18  ;;  %v526_v25 = vadd.f32 %v518_v3, %v462_v19  ;;  %v783_v7 = vpop.eup %782  ;;  %v520_v38 = vmul.f32 %v781_v11, %v1074_v12 }
 0x142   : > { %533 = vst [vmem:[%s1153_s14 + $0x18] sm:$0xff] %v525_v14  ;;  %v527_v28 = vadd.f32 %v519_v21, %v463_v20  ;;  %v521_v30 = vmul.f32 %v783_v7, %v1066_v8 }
 0x143   : > { %534 = vst [vmem:[%s1153_s14 + $0x20] sm:$0xff] %v526_v25  ;;  %v528_v39 = vadd.f32 %v520_v38, %v464_v37 }
 0x144   : > { %535 = vst [vmem:[%s1153_s14 + $0x28] sm:$0xff] %v527_v28  ;;  %v529_v44 = vadd.f32 %v521_v30, %v465_v29 }
 0x145   : > { %536 = vst [vmem:[%s1153_s14 + $0x30] sm:$0xff] %v528_v39 }
 0x146   : > { %537 = vst [vmem:[%s1153_s14 + $0x38] sm:$0xff] %v529_v44 }
 0x147   : > { %827 = shalt.err (!%p824_p5)
}
 0x148   : > { %s828_s26 = scalar_lea.hbm %s1176_s8, 1024  ;;  %s832_s12 = scalar_lea.hbm %s1233_s4, 2048 }
 0x149   : > { %p829_p4 = scmp.ne.s32.totalorder %s1176_s8, %s828_s26  ;;  %p833_p12 = scmp.lt.u32.totalorder %s1176_s8, %s1233_s4 }
 0x14a   : > { %p834_p1 = scmp.lt.u32.totalorder %s832_s12, %s828_s26  ;;  %p836_p8 = scmp.lt.u32.totalorder %s828_s26, %s1176_s8 }
 0x14b   : > { %p830_p7 = pnand %p829_p4, %p1241_p9 }
 0x14c   : > { %p835_p3 = por %p834_p1, %p833_p12 }
 0x14d   : > { %p831_p10 = pneg %p830_p7 }
 0x14e   : > { %p837_p11 = por %p836_p8, %p835_p3 }
 0x150   : > { %p838_p0 = pnand %p837_p11, %p831_p10 }
 0x152   : > { %841 = shalt.err (!%p838_p0)
}
 0x153   : > { %s905_s24 = smov 256   ;;  %s906_s5 = smov 16  }
 0x154   : > { %677 = dma.vmem_to_hbm [thread:$0]  (%p1241_p9), %s1178_s6, 1024, %s1176_s8, %s539_s18, %s905_s24, %s905_s24, %s906_s5  }
 0x155 PF: > { %s569_s7 = sand.u32 1, %s876_s15   ;;  %p1242_p6 = scmp.ne.s32.totalorder %s1238_s30, 0 }
 0x156   : > { %p1243_p13 = scmp.ge.s32.totalorder %s896_s20, 2  ;;  %s570_s9 = scalar_lea.sflag [#allocation4], %s569_s7 }
 0x158   : > { %p684_p2 = pnand %p1243_p13, %p1242_p6 }
 0x15a   : > { %871 = dma.done.wait (!%p684_p2), %s570_s9, 1024  }
 0x15b   : > { %873 = vsyncadd (!%p684_p2), %s570_s9, 4294966272  ;;  %s20_s20 = sadd.s32 1, %s896_s20   ;;  %s1244_s15 = smov %s880_s16 }
 0x15c   : > { %p17_p5 = scmp.ge.s32.totalorder %s20_s20, 4   ;;  %s1245_s16 = smov %s884_s17 }
 0x15d   : > { %s1246_s17 = smov %s988_s29  ;;  %s1247_s18 = smov %s892_s19 }
 0x15e   : > { %s1248_s19 = smov %s1250_s23  ;;  %19 = sbr.rel (!%p17_p5) target bundleno = 6 (0x6), region = 81 }
 0x165   :  { %575 = vsyncpa [#allocation3], 1 }
 0x166   :  { %577 = vsyncpa [#allocation3 + $0x1], 1 }
 0x167   :  { %578 = vsyncpa [#allocation4], 1 }
 0x168   :  { %580 = vsyncpa [#allocation4 + $0x1], 1 }

</bundles_post_ra>
